<compile_context>
chip_gen: v7x
topology: tpu7x:2x2x1
jax: 0.10.0
libtpu: 0.0.40
codegen_flags: <defaults>
</compile_context>

<pallas_src>
import jax
import jax.numpy as jnp
from jax.experimental import pallas as pl
from jax.experimental.pallas import tpu as pltpu

LOG_SIG_MAX = 2.0
LOG_SIG_MIN = -20.0


# ----------------------------------------------------------------------------
# Kernel
# ----------------------------------------------------------------------------
def gaussian_policy_kernel(x_ref, w1_ref, b1_ref, w2_ref, b2_ref,
                           wh_ref, bh_ref, lo_ref, hi_ref, out_ref):
    """One batch tile of the full MLP.

    out_ref is [tb, Np] = [ mean (A cols) | log_std (A cols) | zero padding ].
    """
    cdt = w1_ref.dtype  # MXU operand dtype (bf16 or f32); accumulation is f32.

    x = x_ref[...].astype(cdt)

    # linear1 + ReLU
    h1 = jnp.dot(x, w1_ref[...], preferred_element_type=jnp.float32) + b1_ref[...]
    h1 = jnp.maximum(h1, 0.0)

    # linear2 + ReLU
    h2 = jnp.dot(h1.astype(cdt), w2_ref[...],
                 preferred_element_type=jnp.float32) + b2_ref[...]
    h2 = jnp.maximum(h2, 0.0)

    # Fused heads: one MXU pass produces [tb, Np] = [mean | log_std | pad].
    heads = jnp.dot(h2.astype(cdt), wh_ref[...],
                    preferred_element_type=jnp.float32) + bh_ref[...]

    # Per-column clip bounds: identity on mean columns, LOG_SIG_MIN/MAX on the
    # log_std columns, 0/0 on padding.  Just a max + min in the epilogue.
    out_ref[...] = jnp.minimum(jnp.maximum(heads, lo_ref[...]),
                               hi_ref[...]).astype(out_ref.dtype)


# ----------------------------------------------------------------------------
# Helpers
# ----------------------------------------------------------------------------
def _round_up(x, m):
    return ((x + m - 1) // m) * m


def _ceil_div(a, b):
    return -(-a // b)


def _tensorcores_per_chip():
    """Best-effort detection of TensorCores per chip (v7x has 2)."""
    try:
        info = pltpu.get_tpu_info()
        for attr in ("num_tensorcores", "tensorcores_per_chip", "num_cores"):
            if hasattr(info, attr):
                v = int(getattr(info, attr))
                if v > 0:
                    return v
        cv = getattr(info, "chip_version", None)
        if cv is not None and "7" in str(cv):
            return 2
    except Exception:
        pass
    try:
        kind = jax.devices()[0].device_kind.lower()
        if "v7" in kind or "7x" in kind:
            return 2
    except Exception:
        pass
    return 1


def _choose_batch_tiling(B, two_cores, max_tile=1024):
    """Pick (batch_tile, padded_batch).

    1-TC chips (v5e/v6e): a single maximal tile (<= max_tile rows) — extra grid
    steps are pure per-step overhead there.
    2-TC chips (v7x): an even number (>=2) of balanced steps so the 'parallel'
    batch axis can be sharded across both TensorCores.
    """
    Bp = _round_up(max(B, 1), 8)
    if two_cores and Bp > 8:
        steps = max(2, _ceil_div(Bp, max_tile))
        if steps % 2:
            steps += 1
    else:
        steps = max(1, _ceil_div(Bp, max_tile))
    tb = _round_up(_ceil_div(Bp, steps), 8)
    return tb, tb * steps


# ----------------------------------------------------------------------------
# One-time parameter preparation (hoisted out of the forward path)
# ----------------------------------------------------------------------------
def prepare_policy_params(params, *, compute_dtype=jnp.bfloat16):
    """Fuse the two heads, cast MXU operands, and zero-pad to lane-dense
    (multiples of 128) shapes.  Call once; reuse the result for every forward."""
    K, H = params["w1"].shape
    A = params["wm"].shape[1]
    Kp = _round_up(K, 128)
    Hp = _round_up(H, 128)
    Np = _round_up(2 * A, 128)

    def pad2(w, rows, cols):
        return jnp.pad(w, ((0, rows - w.shape[0]), (0, cols - w.shape[1])))

    wh_raw = jnp.concatenate([params["wm"], params["ws"]], axis=1)      # [H, 2A]
    bh_raw = jnp.concatenate([params["bm"].reshape(1, -1),
                              params["bs"].reshape(1, -1)], axis=1)     # [1, 2A]

    prepared = {
        "w1": pad2(params["w1"], Kp, Hp).astype(compute_dtype),
        "w2": pad2(params["w2"], Hp, Hp).astype(compute_dtype),
        "wh": pad2(wh_raw, Hp, Np).astype(compute_dtype),
        "b1": pad2(params["b1"].reshape(1, -1), 1, Hp).astype(jnp.float32),
        "b2": pad2(params["b2"].reshape(1, -1), 1, Hp).astype(jnp.float32),
        "bh": pad2(bh_raw, 1, Np).astype(jnp.float32),
    }

    # Per-column clip bounds.
    col = jnp.arange(Np)
    lo = jnp.where(col < A, -jnp.inf,
                   jnp.where(col < 2 * A, jnp.float32(LOG_SIG_MIN), 0.0))
    hi = jnp.where(col < A, jnp.inf,
                   jnp.where(col < 2 * A, jnp.float32(LOG_SIG_MAX), 0.0))
    prepared["lo"] = lo.reshape(1, Np).astype(jnp.float32)
    prepared["hi"] = hi.reshape(1, Np).astype(jnp.float32)

    prepared.update(num_inputs=K, hidden_dim=H, num_actions=A,
                    Kp=Kp, Hp=Hp, Np=Np)
    return prepared


# ----------------------------------------------------------------------------
# Forward
# ----------------------------------------------------------------------------
def gaussian_policy_forward(state, prepared, *, batch_tile=None,
                            single_buffer_weights=False):
    """state: [B, num_inputs] f32; prepared: output of prepare_policy_params.

    Returns (mean, log_std), each [B, num_actions] f32."""
    B, K = state.shape
    assert K == prepared["num_inputs"], "state feature dim mismatch"
    A = prepared["num_actions"]
    Kp, Hp, Np = prepared["Kp"], prepared["Hp"], prepared["Np"]

    two_cores = _tensorcores_per_chip() >= 2
    if batch_tile is None:
        tb, Bp = _choose_batch_tiling(B, two_cores)
    else:
        tb = int(batch_tile)
        assert tb % 8 == 0, "batch_tile must be a multiple of 8"
        Bp = _round_up(max(B, 1), tb)

    # Pad batch rows / feature columns with zeros (exact; sliced off below).
    if Bp != B or Kp != K:
        state = jnp.pad(state, ((0, Bp - B), (0, Kp - K)))

    # Grid-invariant blocks (weights / biases / clip bounds).
    def const(shape):
        if single_buffer_weights:
            return pl.BlockSpec(shape, lambda i: (0, 0),
                                pipeline_mode=pl.Buffered(1))
        return pl.BlockSpec(shape, lambda i: (0, 0))

    grid_spec = pltpu.PrefetchScalarGridSpec(
        num_scalar_prefetch=0,
        grid=(Bp // tb,),
        in_specs=[
            pl.BlockSpec((tb, Kp), lambda i: (i, 0)),  # state tile
            const((Kp, Hp)),                           # W1
            const((1, Hp)),                            # b1
            const((Hp, Hp)),                           # W2
            const((1, Hp)),                            # b2
            const((Hp, Np)),                           # Wm||Ws (padded)
            const((1, Np)),                            # bm||bs (padded)
            const((1, Np)),                            # clip lo
            const((1, Np)),                            # clip hi
        ],
        # Single packed lane-dense (>=128 cols) output: mean | log_std | pad.
        out_specs=pl.BlockSpec((tb, Np), lambda i: (i, 0)),
    )

    # Explicit VMEM limit only when the double-buffered footprint would exceed
    # the most conservative default scoped limit (16 MiB on v5e).
    w_item = jnp.dtype(prepared["w1"].dtype).itemsize
    weight_bytes = (Kp * Hp + Hp * Hp + Hp * Np) * w_item
    small_bytes = (2 * Hp + 3 * Np) * 4
    io_bytes = (tb * Kp + tb * Np) * 4
    inter_bytes = (2 * tb * Hp + tb * Np) * 4
    est = 2 * (weight_bytes + small_bytes + io_bytes) + inter_bytes
    vmem_limit = None
    if est > (16 << 20):
        cap = (60 << 20) if two_cores else (100 << 20)
        vmem_limit = int(min(est + (8 << 20), cap))

    packed = pl.pallas_call(
        gaussian_policy_kernel,
        out_shape=jax.ShapeDtypeStruct((Bp, Np), jnp.float32),
        grid_spec=grid_spec,
        compiler_params=pltpu.CompilerParams(
            dimension_semantics=("parallel",),
            vmem_limit_bytes=vmem_limit),
    )(state, prepared["w1"], prepared["b1"], prepared["w2"], prepared["b2"],
      prepared["wh"], prepared["bh"], prepared["lo"], prepared["hi"])

    mean = packed[:B, :A]
    log_std = packed[:B, A:2 * A]
    return mean, log_std


# ----------------------------------------------------------------------------
# Init / reference (pure JAX)
# ----------------------------------------------------------------------------
def xavier_uniform(key, fan_in, fan_out):
    # Matches torch.nn.init.xavier_uniform_(gain=1); stored as (in, out).
    limit = jnp.sqrt(6.0 / (fan_in + fan_out))
    return jax.random.uniform(key, (fan_in, fan_out), jnp.float32, -limit, limit)


def init_params(key, num_inputs, num_actions, hidden_dim):
    k1, k2, k3, k4 = jax.random.split(key, 4)
    return {
        "w1": xavier_uniform(k1, num_inputs, hidden_dim),
        "b1": jnp.zeros((1, hidden_dim), jnp.float32),
        "w2": xavier_uniform(k2, hidden_dim, hidden_dim),
        "b2": jnp.zeros((1, hidden_dim), jnp.float32),
        "wm": xavier_uniform(k3, hidden_dim, num_actions),
        "bm": jnp.zeros((1, num_actions), jnp.float32),
        "ws": xavier_uniform(k4, hidden_dim, num_actions),
        "bs": jnp.zeros((1, num_actions), jnp.float32),
    }


def reference_forward(state, p):
    h1 = jnp.maximum(state @ p["w1"] + p["b1"], 0.0)
    h2 = jnp.maximum(h1 @ p["w2"] + p["b2"], 0.0)
    mean = h2 @ p["wm"] + p["bm"]
    log_std = jnp.clip(h2 @ p["ws"] + p["bs"], LOG_SIG_MIN, LOG_SIG_MAX)
    return mean, log_std


# ----------------------------------------------------------------------------
# Self-test
# ----------------------------------------------------------------------------
if __name__ == "__main__":
    key = jax.random.PRNGKey(0)
    k_param, k_state, k_bias = jax.random.split(key, 3)

    B, num_inputs, num_actions, hidden_dim = 8, 16, 8, 32
    params = init_params(k_param, num_inputs, num_actions, hidden_dim)

    # The module inits biases to 0; perturb them so the broadcast-add path is
    # actually validated against the reference.
    kb1, kb2, kbm, kbs = jax.random.split(k_bias, 4)
    params["b1"] = 0.1 * jax.random.normal(kb1, (1, hidden_dim), jnp.float32)
    params["b2"] = 0.1 * jax.random.normal(kb2, (1, hidden_dim), jnp.float32)
    params["bm"] = 0.1 * jax.random.normal(kbm, (1, num_actions), jnp.float32)
    params["bs"] = 0.1 * jax.random.normal(kbs, (1, num_actions), jnp.float32)

    # Scale state a bit so the log_std clamp path is exercised.
    state = 3.0 * jax.random.normal(k_state, (B, num_inputs), jnp.float32)
    ref_mean, ref_log_std = reference_forward(state, params)

    # Parameter prep happens ONCE (fusion + cast + lane padding), not per call.
    prep_f32 = prepare_policy_params(params, compute_dtype=jnp.float32)
    prep_bf16 = prepare_policy_params(params)   # default bf16 MXU operands

    # Exact-semantics path (f32 MXU operands).
    mean, log_std = gaussian_policy_forward(state, prep_f32)
    jax.block_until_ready((mean, log_std))
    assert mean.shape == (B, num_actions) and log_std.shape == (B, num_actions)
    assert jnp.allclose(mean, ref_mean, atol=1e-4, rtol=1e-4)
    assert jnp.allclose(log_std, ref_log_std, atol=1e-4, rtol=1e-4)

    # Default bf16 MXU-operand path (f32 accumulation) — looser tolerance.
    mean_bf, log_std_bf = gaussian_policy_forward(state, prep_bf16)
    jax.block_until_ready((mean_bf, log_std_bf))
    assert jnp.allclose(mean_bf, ref_mean, atol=0.2, rtol=0.05)
    assert jnp.allclose(log_std_bf, ref_log_std, atol=0.2, rtol=0.05)

    # Awkward batch size (not a multiple of 8): exercises the batch-padding path.
    B2 = 100
    state2 = jax.random.normal(jax.random.PRNGKey(1), (B2, num_inputs), jnp.float32)
    ref_mean2, ref_log_std2 = reference_forward(state2, params)
    mean2, log_std2 = gaussian_policy_forward(state2, prep_f32)
    jax.block_until_ready((mean2, log_std2))
    assert mean2.shape == (B2, num_actions) and log_std2.shape == (B2, num_actions)
    assert jnp.allclose(mean2, ref_mean2, atol=1e-4, rtol=1e-4)
    assert jnp.allclose(log_std2, ref_log_std2, atol=1e-4, rtol=1e-4)

    # Forced multi-step grid (exercises batch pipelining regardless of chip).
    B3 = 128
    state3 = jax.random.normal(jax.random.PRNGKey(2), (B3, num_inputs), jnp.float32)
    ref_mean3, ref_log_std3 = reference_forward(state3, params)
    mean3, log_std3 = gaussian_policy_forward(state3, prep_f32, batch_tile=64)
    jax.block_until_ready((mean3, log_std3))
    assert jnp.allclose(mean3, ref_mean3, atol=1e-4, rtol=1e-4)
    assert jnp.allclose(log_std3, ref_log_std3, atol=1e-4, rtol=1e-4)

    # TODO(synk): sample() (rsample / tanh squash / log_prob) is host-side
    # distribution glue, not implemented in the kernel.
    print("KERNEL_OK")
</pallas_src>

<mosaic_0001>
module attributes {stable_mosaic.version = 11 : i64} {
  func.func @gaussian_policy_kernel(%arg0: i32, %arg1: memref<8x128xf32, #tpu.memory_space<vmem>>, %arg2: memref<128x128xf32, #tpu.memory_space<vmem>>, %arg3: memref<1x128xf32, #tpu.memory_space<vmem>>, %arg4: memref<128x128xf32, #tpu.memory_space<vmem>>, %arg5: memref<1x128xf32, #tpu.memory_space<vmem>>, %arg6: memref<128x128xf32, #tpu.memory_space<vmem>>, %arg7: memref<1x128xf32, #tpu.memory_space<vmem>>, %arg8: memref<1x128xf32, #tpu.memory_space<vmem>>, %arg9: memref<1x128xf32, #tpu.memory_space<vmem>>, %arg10: memref<8x128xf32, #tpu.memory_space<vmem>>) attributes {dimension_semantics = [#tpu.dimension_semantics<parallel>], iteration_bounds = array<i64: 1>, scalar_prefetch = 0 : i64, scratch_operands = 0 : i64, tpu.core_type = #tpu.core_type<tc>, window_params = [{transform_indices = @transform_0, window_bounds = array<i64: 8, 128>}, {pipeline_mode = #tpu.pipeline_mode<synchronous>, transform_indices = @transform_1, window_bounds = array<i64: 128, 128>}, {pipeline_mode = #tpu.pipeline_mode<synchronous>, transform_indices = @transform_2, window_bounds = array<i64: 1, 128>}, {pipeline_mode = #tpu.pipeline_mode<synchronous>, transform_indices = @transform_3, window_bounds = array<i64: 128, 128>}, {pipeline_mode = #tpu.pipeline_mode<synchronous>, transform_indices = @transform_4, window_bounds = array<i64: 1, 128>}, {pipeline_mode = #tpu.pipeline_mode<synchronous>, transform_indices = @transform_5, window_bounds = array<i64: 128, 128>}, {pipeline_mode = #tpu.pipeline_mode<synchronous>, transform_indices = @transform_6, window_bounds = array<i64: 1, 128>}, {pipeline_mode = #tpu.pipeline_mode<synchronous>, transform_indices = @transform_7, window_bounds = array<i64: 1, 128>}, {pipeline_mode = #tpu.pipeline_mode<synchronous>, transform_indices = @transform_8, window_bounds = array<i64: 1, 128>}, {transform_indices = @transform_9, window_bounds = array<i64: 8, 128>}]} {
    %c0 = arith.constant 0 : index
    %c0_0 = arith.constant 0 : index
    %0 = vector.load %arg1[%c0, %c0_0] : memref<8x128xf32, #tpu.memory_space<vmem>>, vector<8x128xf32>
    %c0_1 = arith.constant 0 : index
    %c0_2 = arith.constant 0 : index
    %1 = vector.load %arg2[%c0_1, %c0_2] : memref<128x128xf32, #tpu.memory_space<vmem>>, vector<128x128xf32>
    %cst = arith.constant dense<0.000000e+00> : vector<8x128xf32>
    %2 = tpu.matmul %0, %1, %cst {dimension_numbers = #tpu.dot_dimension_numbers<[1], [0], [0], [1], [0, 0, 1, 1], [], []>} : vector<8x128xf32>, vector<128x128xf32>, vector<8x128xf32> -> vector<8x128xf32>
    %c0_3 = arith.constant 0 : index
    %c0_4 = arith.constant 0 : index
    %3 = vector.load %arg3[%c0_3, %c0_4] : memref<1x128xf32, #tpu.memory_space<vmem>>, vector<1x128xf32>
    %4 = vector.broadcast %3 : vector<1x128xf32> to vector<8x128xf32>
    %5 = arith.addf %2, %4 : vector<8x128xf32>
    %cst_5 = arith.constant 0.000000e+00 : f32
    %6 = vector.broadcast %cst_5 : f32 to vector<8x128xf32>
    %7 = arith.maximumf %5, %6 : vector<8x128xf32>
    %c0_6 = arith.constant 0 : index
    %c0_7 = arith.constant 0 : index
    %8 = vector.load %arg4[%c0_6, %c0_7] : memref<128x128xf32, #tpu.memory_space<vmem>>, vector<128x128xf32>
    %cst_8 = arith.constant dense<0.000000e+00> : vector<8x128xf32>
    %9 = tpu.matmul %7, %8, %cst_8 {dimension_numbers = #tpu.dot_dimension_numbers<[1], [0], [0], [1], [0, 0, 1, 1], [], []>} : vector<8x128xf32>, vector<128x128xf32>, vector<8x128xf32> -> vector<8x128xf32>
    %c0_9 = arith.constant 0 : index
    %c0_10 = arith.constant 0 : index
    %10 = vector.load %arg5[%c0_9, %c0_10] : memref<1x128xf32, #tpu.memory_space<vmem>>, vector<1x128xf32>
    %11 = vector.broadcast %10 : vector<1x128xf32> to vector<8x128xf32>
    %12 = arith.addf %9, %11 : vector<8x128xf32>
    %cst_11 = arith.constant 0.000000e+00 : f32
    %13 = vector.broadcast %cst_11 : f32 to vector<8x128xf32>
    %14 = arith.maximumf %12, %13 : vector<8x128xf32>
    %c0_12 = arith.constant 0 : index
    %c0_13 = arith.constant 0 : index
    %15 = vector.load %arg6[%c0_12, %c0_13] : memref<128x128xf32, #tpu.memory_space<vmem>>, vector<128x128xf32>
    %cst_14 = arith.constant dense<0.000000e+00> : vector<8x128xf32>
    %16 = tpu.matmul %14, %15, %cst_14 {dimension_numbers = #tpu.dot_dimension_numbers<[1], [0], [0], [1], [0, 0, 1, 1], [], []>} : vector<8x128xf32>, vector<128x128xf32>, vector<8x128xf32> -> vector<8x128xf32>
    %c0_15 = arith.constant 0 : index
    %c0_16 = arith.constant 0 : index
    %17 = vector.load %arg7[%c0_15, %c0_16] : memref<1x128xf32, #tpu.memory_space<vmem>>, vector<1x128xf32>
    %18 = vector.broadcast %17 : vector<1x128xf32> to vector<8x128xf32>
    %19 = arith.addf %16, %18 : vector<8x128xf32>
    %c0_17 = arith.constant 0 : index
    %c0_18 = arith.constant 0 : index
    %20 = vector.load %arg8[%c0_17, %c0_18] : memref<1x128xf32, #tpu.memory_space<vmem>>, vector<1x128xf32>
    %21 = vector.broadcast %20 : vector<1x128xf32> to vector<8x128xf32>
    %22 = arith.maximumf %19, %21 : vector<8x128xf32>
    %c0_19 = arith.constant 0 : index
    %c0_20 = arith.constant 0 : index
    %23 = vector.load %arg9[%c0_19, %c0_20] : memref<1x128xf32, #tpu.memory_space<vmem>>, vector<1x128xf32>
    %24 = vector.broadcast %23 : vector<1x128xf32> to vector<8x128xf32>
    %25 = arith.minimumf %22, %24 : vector<8x128xf32>
    %c0_21 = arith.constant 0 : index
    %c0_22 = arith.constant 0 : index
    %26 = vector.load %arg10[%c0_21, %c0_22] : memref<8x128xf32, #tpu.memory_space<vmem>>, vector<8x128xf32>
    tpu.vector_store %arg10[%c0_21, %c0_22], %25 {strides = array<i32>} : memref<8x128xf32, #tpu.memory_space<vmem>>, vector<8x128xf32>,
    return
  }
  func.func @transform_0(%arg0: i32) -> (i32, i32) {
    %c0_i32 = arith.constant 0 : i32
    %c0_i32_0 = arith.constant 0 : i32
    return %arg0, %c0_i32 : i32, i32
  }
  func.func @transform_1(%arg0: i32) -> (i32, i32) {
    %c0_i32 = arith.constant 0 : i32
    %c0_i32_0 = arith.constant 0 : i32
    %c0_i32_1 = arith.constant 0 : i32
    return %c0_i32, %c0_i32_0 : i32, i32
  }
  func.func @transform_2(%arg0: i32) -> (i32, i32) {
    %c0_i32 = arith.constant 0 : i32
    %c0_i32_0 = arith.constant 0 : i32
    %c0_i32_1 = arith.constant 0 : i32
    return %c0_i32, %c0_i32_0 : i32, i32
  }
  func.func @transform_3(%arg0: i32) -> (i32, i32) {
    %c0_i32 = arith.constant 0 : i32
    %c0_i32_0 = arith.constant 0 : i32
    %c0_i32_1 = arith.constant 0 : i32
    return %c0_i32, %c0_i32_0 : i32, i32
  }
  func.func @transform_4(%arg0: i32) -> (i32, i32) {
    %c0_i32 = arith.constant 0 : i32
    %c0_i32_0 = arith.constant 0 : i32
    %c0_i32_1 = arith.constant 0 : i32
    return %c0_i32, %c0_i32_0 : i32, i32
  }
  func.func @transform_5(%arg0: i32) -> (i32, i32) {
    %c0_i32 = arith.constant 0 : i32
    %c0_i32_0 = arith.constant 0 : i32
    %c0_i32_1 = arith.constant 0 : i32
    return %c0_i32, %c0_i32_0 : i32, i32
  }
  func.func @transform_6(%arg0: i32) -> (i32, i32) {
    %c0_i32 = arith.constant 0 : i32
    %c0_i32_0 = arith.constant 0 : i32
    %c0_i32_1 = arith.constant 0 : i32
    return %c0_i32, %c0_i32_0 : i32, i32
  }
  func.func @transform_7(%arg0: i32) -> (i32, i32) {
    %c0_i32 = arith.constant 0 : i32
    %c0_i32_0 = arith.constant 0 : i32
    %c0_i32_1 = arith.constant 0 : i32
    return %c0_i32, %c0_i32_0 : i32, i32
  }
  func.func @transform_8(%arg0: i32) -> (i32, i32) {
    %c0_i32 = arith.constant 0 : i32
    %c0_i32_0 = arith.constant 0 : i32
    %c0_i32_1 = arith.constant 0 : i32
    return %c0_i32, %c0_i32_0 : i32, i32
  }
  func.func @transform_9(%arg0: i32) -> (i32, i32) {
    %c0_i32 = arith.constant 0 : i32
    %c0_i32_0 = arith.constant 0 : i32
    return %arg0, %c0_i32 : i32, i32
  }
}

</mosaic_0001>

<bundles_post_ra>
// kernel: tpu_custom_call.1
= control target key start
LH: loop header
LB: loop body
LE: loop exit
PB: predicated region body
PF: predicated region fallthrough
CT: control target
= control target key end

     0   :  { %14 = vsyncpa [#allocation3], 0  ;;  %s937_s0 = inlined_call_operand.hbm [shape: f32[8,128], index: 0, kind: input, shape index: {}]   ;;  %s938_s1 = inlined_call_operand.hbm [shape: f32[128,128], index: 1, kind: input, shape index: {}]   ;;  %s939_s2 = inlined_call_operand.vmem [shape: f32[1,128], index: 2, kind: input, shape index: {}]   ;;  %s940_s3 = inlined_call_operand.hbm [shape: f32[128,128], index: 3, kind: input, shape index: {}]   ;;  %s941_s4 = inlined_call_operand.vmem [shape: f32[1,128], index: 4, kind: input, shape index: {}]   ;;  %s942_s5 = inlined_call_operand.hbm [shape: f32[128,128], index: 5, kind: input, shape index: {}]   ;;  %s943_s6 = inlined_call_operand.vmem [shape: f32[1,128], index: 6, kind: input, shape index: {}]   ;;  %s944_s7 = inlined_call_operand.vmem [shape: f32[1,128], index: 7, kind: input, shape index: {}]   ;;  %s945_s8 = inlined_call_operand.vmem [shape: f32[1,128], index: 8, kind: input, shape index: {}]   ;;  %s946_s9 = inlined_call_operand.hbm [shape: f32[8,128], index: 9, kind: output, shape index: {}]  }
   0x1   :  { %15 = vsyncpa [#allocation6], 0 }
   0x2   :  { %16 = vsyncpa [#allocation9], 0 }
   0x3   :  { %17 = vsyncpa [#allocation4], 0  ;;  %s763_s30 = smov [#allocation5]   ;;  %s645_s13 = scalar_lea.hbm %s938_s1, 2048 }
   0x4   :  { %s33_s10 = sshll.u32 %s763_s30, 4  ;;  %p646_p0 = scmp.ne.s32.totalorder %s938_s1, %s645_s13  ;;  %s34_s10 = int_to_ptr.vmem [resolvable:$true] %s33_s10 }
   0x5   :  { %p649_p1 = scmp.lt.u32.totalorder %s645_s13, %s938_s1 }
   0x7   :  { %p651_p2 = pnand %p649_p1, %p646_p0 }
   0x9   :  { %654 = shalt.err (!%p651_p2)
}
   0xa   :  { %s655_s18 = scalar_lea.vmem %s34_s10, 2048  ;;  %p660_p4 = scmp.lt.s32.totalorder %s34_s10, %s34_s10 }
   0xb   :  { %p656_p3 = scmp.ne.s32.totalorder %s34_s10, %s655_s18  ;;  %p661_p5 = scmp.lt.s32.totalorder %s655_s18, %s655_s18 }
   0xd   :  { %p662_p6 = por %p661_p5, %p660_p4 }
   0xf   :  { %p663_p7 = pnand %p662_p6, %p656_p3 }
  0x11   :  { %666 = shalt.err (!%p663_p7)
}
  0x12   :  { %s764_s19 = smov 128   ;;  %s765_s20 = smov 8  }
  0x13   :  { %39 = dma.hbm_to_vmem [thread:$0]  %s938_s1, 2048, %s34_s10, [#allocation6], %s764_s19, %s764_s19, %s765_s20  }
  0x14   :  { %s766_s23 = smov [#allocation2]   ;;  %s767_s25 = smov [#allocation7]  }
  0x15   :  { %s24_s24 = sshll.u32 %s766_s23, 4  ;;  %s47_s26 = sshll.u32 %s767_s25, 4  ;;  %s25_s24 = int_to_ptr.vmem [resolvable:$true] %s24_s24  ;;  %s48_s26 = int_to_ptr.vmem [resolvable:$true] %s47_s26 }
  0x16   :  { %s667_s29 = scalar_lea.hbm %s937_s0, 128 }
  0x17   :  { %p668_p8 = scmp.ne.s32.totalorder %s937_s0, %s667_s29  ;;  %p671_p9 = scmp.lt.u32.totalorder %s667_s29, %s937_s0 }
  0x19   :  { %p673_p10 = pnand %p671_p9, %p668_p8 }
  0x1b   :  { %676 = shalt.err (!%p673_p10)
}
  0x1c   :  { %s677_s1 = scalar_lea.vmem %s25_s24, 128  ;;  %p682_p12 = scmp.lt.s32.totalorder %s25_s24, %s25_s24 }
  0x1d   :  { %p678_p11 = scmp.ne.s32.totalorder %s25_s24, %s677_s1  ;;  %p683_p13 = scmp.lt.s32.totalorder %s677_s1, %s677_s1 }
  0x1f   :  { %p684_p0 = por %p683_p13, %p682_p12 }
  0x21   :  { %p685_p1 = pnand %p684_p0, %p678_p11 }
  0x23   :  { %688 = shalt.err (!%p685_p1)
}
  0x24   :  { %27 = dma.hbm_to_vmem [thread:$0]  %s937_s0, 128, %s25_s24, [#allocation3]  }
  0x25   :  { %s689_s17 = scalar_lea.hbm %s940_s3, 2048 }
  0x26   :  { %p690_p2 = scmp.ne.s32.totalorder %s940_s3, %s689_s17  ;;  %p693_p3 = scmp.lt.u32.totalorder %s689_s17, %s940_s3 }
  0x28   :  { %p695_p4 = pnand %p693_p3, %p690_p2 }
  0x2a   :  { %698 = shalt.err (!%p695_p4)
}
  0x2b   :  { %s699_s25 = scalar_lea.vmem %s48_s26, 2048  ;;  %p704_p6 = scmp.lt.s32.totalorder %s48_s26, %s48_s26 }
  0x2c   :  { %p700_p5 = scmp.ne.s32.totalorder %s48_s26, %s699_s25  ;;  %p705_p7 = scmp.lt.s32.totalorder %s699_s25, %s699_s25 }
  0x2e   :  { %p706_p8 = por %p705_p7, %p704_p6 }
  0x30   :  { %p707_p9 = pnand %p706_p8, %p700_p5 }
  0x32   :  { %710 = shalt.err (!%p707_p9)
}
  0x33   :  { %53 = dma.hbm_to_vmem [thread:$0]  %s940_s3, 2048, %s48_s26, [#allocation6], %s764_s19, %s764_s19, %s765_s20  }
  0x34   :  { %s768_s27 = smov [#allocation8]   ;;  %s711_s11 = scalar_lea.hbm %s942_s5, 2048 }
  0x35   :  { %s61_s28 = sshll.u32 %s768_s27, 4  ;;  %p712_p10 = scmp.ne.s32.totalorder %s942_s5, %s711_s11  ;;  %s62_s28 = int_to_ptr.vmem [resolvable:$true] %s61_s28 }
  0x36   :  { %p715_p11 = scmp.lt.u32.totalorder %s711_s11, %s942_s5 }
  0x38   :  { %p717_p12 = pnand %p715_p11, %p712_p10 }
  0x3a   :  { %720 = shalt.err (!%p717_p12)
}
  0x3b   :  { %s721_s14 = scalar_lea.vmem %s62_s28, 2048  ;;  %p726_p0 = scmp.lt.s32.totalorder %s62_s28, %s62_s28 }
  0x3c   :  { %p722_p13 = scmp.ne.s32.totalorder %s62_s28, %s721_s14  ;;  %p727_p1 = scmp.lt.s32.totalorder %s721_s14, %s721_s14 }
  0x3e   :  { %p728_p2 = por %p727_p1, %p726_p0 }
  0x40   :  { %p729_p3 = pnand %p728_p2, %p722_p13 }
  0x42   :  { %732 = shalt.err (!%p729_p3)
}
  0x43   :  { %67 = dma.hbm_to_vmem [thread:$0]  %s942_s5, 2048, %s62_s28, [#allocation9], %s764_s19, %s764_s19, %s765_s20  }
  0x44   :  { %755 = dma.done.wait [#allocation3], 128  }
  0x45   :  { %756 = vsyncadd [#allocation3], 4294967168 }
  0x46   :  { %757 = dma.done.wait [#allocation6], 4096  }
  0x47   :  { %758 = vsyncadd [#allocation6], 4294963200 }
  0x48   :  { %759 = dma.done.wait [#allocation9], 2048  }
  0x49   :  { %760 = vsyncadd [#allocation9], 4294965248  ;;  %v769_v0 = vmov 0.0|0.0   ;;  %vm770_vm0 = vmmov 0   ;;  %v771_v1 = vmov 0.0   ;;  %v87_v2 = vld [vmem:[#allocation5] sm:$0xff] }
  0x4a   :  { %563 = vmatprep.subr.bf16.mxu0 %v769_v0  ;;  %490 = vmatprep.mubr.msk.f32.mxu0 %vm770_vm0, %v771_v1  ;;  %v88_v3 = vld [vmem:[#allocation5 + $0x8] sm:$0xff]  ;;  %v89_v4 = vld [vmem:[#allocation5 + $0x10] sm:$0xff]  ;;  %v90_v6 = vld [vmem:[#allocation5 + $0x18] sm:$0xff] }
  0x4b   :  { %587 = vmatprep.subr.bf16.mxu1 %v769_v0  ;;  %525 = vmatprep.mubr.msk.f32.mxu1 %vm770_vm0, %v771_v1  ;;  %v564_v5 = vpack.c.bf16 %v88_v3, %v87_v2  ;;  %v567_v7 = vpack.c.bf16 %v90_v6, %v89_v4  ;;  %v91_v8 = vld [vmem:[#allocation5 + $0x20] sm:$0xff]  ;;  %v92_v9 = vld [vmem:[#allocation5 + $0x28] sm:$0xff]  ;;  %v183_v12 = vld [vmem:[#allocation7 + $0x10] sm:$0xff] }
  0x4c   :  { %v181_v10 = vld [vmem:[#allocation7] sm:$0xff]  ;;  %v182_v11 = vld [vmem:[#allocation7 + $0x8] sm:$0xff]  ;;  %v184_v13 = vld [vmem:[#allocation7 + $0x18] sm:$0xff]  ;;  %v570_v14 = vpack.c.bf16 %v92_v9, %v91_v8 }
  0x4d   :  { %565 = vmatpush3.bf16.msra.mxu0 %v564_v5  ;;  %v588_v15 = vpack.c.bf16 %v182_v11, %v181_v10  ;;  %v93_v16 = vld [vmem:[#allocation5 + $0x30] sm:$0xff]  ;;  %v94_v17 = vld [vmem:[#allocation5 + $0x38] sm:$0xff]  ;;  %v591_v18 = vpack.c.bf16 %v184_v13, %v183_v12  ;;  %v185_v19 = vld [vmem:[#allocation7 + $0x20] sm:$0xff] }
  0x4e   :  { %566 = vmatprep.subr.bf16.mxu0 %v769_v0  ;;  %v186_v20 = vld [vmem:[#allocation7 + $0x28] sm:$0xff]  ;;  %v573_v21 = vpack.c.bf16 %v94_v17, %v93_v16  ;;  %v95_v22 = vld [vmem:[#allocation5 + $0x40] sm:$0xff]  ;;  %v187_v25 = vld [vmem:[#allocation7 + $0x30] sm:$0xff] }
  0x4f   :  { %589 = vmatpush3.bf16.msra.mxu1 %v588_v15  ;;  %v96_v23 = vld [vmem:[#allocation5 + $0x48] sm:$0xff]  ;;  %v594_v24 = vpack.c.bf16 %v186_v20, %v185_v19  ;;  %v188_v26 = vld [vmem:[#allocation7 + $0x38] sm:$0xff]  ;;  %v97_v28 = vld [vmem:[#allocation5 + $0x50] sm:$0xff] }
  0x50   :  { %590 = vmatprep.subr.bf16.mxu1 %v769_v0  ;;  %v576_v27 = vpack.c.bf16 %v96_v23, %v95_v22  ;;  %v98_v29 = vld [vmem:[#allocation5 + $0x58] sm:$0xff]  ;;  %v597_v30 = vpack.c.bf16 %v188_v26, %v187_v25  ;;  %v189_v31 = vld [vmem:[#allocation7 + $0x40] sm:$0xff]  ;;  %v190_v32 = vld [vmem:[#allocation7 + $0x48] sm:$0xff] }
  0x51   :  { %568 = vmatpush3.bf16.msra.mxu0 %v567_v7  ;;  %v579_v33 = vpack.c.bf16 %v98_v29, %v97_v28  ;;  %v99_v34 = vld [vmem:[#allocation5 + $0x60] sm:$0xff]  ;;  %v100_v35 = vld [vmem:[#allocation5 + $0x68] sm:$0xff]  ;;  %v600_v36 = vpack.c.bf16 %v190_v32, %v189_v31  ;;  %v191_v37 = vld [vmem:[#allocation7 + $0x50] sm:$0xff] }
  0x52   :  { %569 = vmatprep.subr.bf16.mxu0 %v769_v0  ;;  %v192_v38 = vld [vmem:[#allocation7 + $0x58] sm:$0xff]  ;;  %v582_v39 = vpack.c.bf16 %v100_v35, %v99_v34  ;;  %v101_v40 = vld [vmem:[#allocation5 + $0x70] sm:$0xff]  ;;  %v193_v43 = vld [vmem:[#allocation7 + $0x60] sm:$0xff] }
  0x53   :  { %592 = vmatpush3.bf16.msra.mxu1 %v591_v18  ;;  %v102_v41 = vld [vmem:[#allocation5 + $0x78] sm:$0xff]  ;;  %v603_v42 = vpack.c.bf16 %v192_v38, %v191_v37  ;;  %v194_v44 = vld [vmem:[#allocation7 + $0x68] sm:$0xff]  ;;  %v195_v48 = vld [vmem:[#allocation7 + $0x70] sm:$0xff] }
  0x54   :  { %593 = vmatprep.subr.bf16.mxu1 %v769_v0  ;;  %v585_v45 = vpack.c.bf16 %v102_v41, %v101_v40  ;;  %v606_v46 = vpack.c.bf16 %v194_v44, %v193_v43  ;;  %v86_v47 = vld [vmem:[#allocation2] sm:$0xff]  ;;  %v275_v51 = vld [vmem:[#allocation8] sm:$0xff]  ;;  %v276_v52 = vld [vmem:[#allocation8 + $0x8] sm:$0xff] }
  0x55   :  { %571 = vmatpush3.bf16.msra.mxu0 %v570_v14  ;;  %v196_v49 = vld [vmem:[#allocation7 + $0x78] sm:$0xff]  ;;  %v277_v53 = vld [vmem:[#allocation8 + $0x10] sm:$0xff]  ;;  %v612_v54 = vpack.c.bf16 %v276_v52, %v275_v51  ;;  %v279_v57 = vld [vmem:[#allocation8 + $0x20] sm:$0xff] }
  0x56   :  { %572 = vmatprep.subr.bf16.mxu0 %v769_v0  ;;  %v609_v50 = vpack.c.bf16 %v196_v49, %v195_v48  ;;  %v278_v55 = vld [vmem:[#allocation8 + $0x18] sm:$0xff]  ;;  %v280_v58 = vld [vmem:[#allocation8 + $0x28] sm:$0xff]  ;;  %v281_v60 = vld [vmem:[#allocation8 + $0x30] sm:$0xff] }
  0x57   :  { %595 = vmatpush3.bf16.msra.mxu1 %v594_v24  ;;  %v615_v56 = vpack.c.bf16 %v278_v55, %v277_v53  ;;  %v618_v59 = vpack.c.bf16 %v280_v58, %v279_v57  ;;  %v282_v61 = vld [vmem:[#allocation8 + $0x38] sm:$0xff]  ;;  %v283_v63 = vld [vmem:[#allocation8 + $0x40] sm:$0xff]  ;;  %v285_v3 = vld [vmem:[#allocation8 + $0x50] sm:$0xff] }
  0x58   :  { %596 = vmatprep.subr.bf16.mxu1 %v769_v0  ;;  %v621_v62 = vpack.c.bf16 %v282_v61, %v281_v60  ;;  %v286_v4 = vld [vmem:[#allocation8 + $0x58] sm:$0xff]  ;;  %v287_v6 = vld [vmem:[#allocation8 + $0x60] sm:$0xff]  ;;  %v288_v7 = vld [vmem:[#allocation8 + $0x68] sm:$0xff] }
  0x59   :  { %574 = vmatpush3.bf16.msra.mxu0 %v573_v21  ;;  %v627_v5 = vpack.c.bf16 %v286_v4, %v285_v3  ;;  %v630_v8 = vpack.c.bf16 %v288_v7, %v287_v6  ;;  %v402_v9 = vld [vmem:[%s939_s2] ss:$0 sm:$0xff]  ;;  %v289_v14 = vld [vmem:[#allocation8 + $0x70] sm:$0xff] }
  0x5a   :  { %575 = vmatprep.subr.bf16.mxu0 %v769_v0  ;;  %v290_v15 = vld [vmem:[#allocation8 + $0x78] sm:$0xff] }
  0x5b   :  { %598 = vmatpush3.bf16.msra.mxu1 %v597_v30  ;;  %v633_v16 = vpack.c.bf16 %v290_v15, %v289_v14  ;;  %v403_v17 = vld [vmem:[%s941_s4] ss:$0 sm:$0xff]  ;;  %s772_s4 = smov [#allocation10]  }
  0x5c   :  { %599 = vmatprep.subr.bf16.mxu1 %v769_v0  ;;  %v404_v21 = vld [vmem:[%s943_s6] ss:$0 sm:$0xff]  ;;  %s391_s23 = sshll.u32 %s772_s4, 4  ;;  %s392_s23 = int_to_ptr.vmem [resolvable:$true] %s391_s23 }
  0x5d   :  { %577 = vmatpush3.bf16.msra.mxu0 %v576_v27  ;;  %v405_v23 = vld [vmem:[%s944_s7] ss:$0 sm:$0xff]  ;;  %s733_s25 = scalar_lea.vmem %s392_s23, 128  ;;  %p738_p5 = scmp.lt.s32.totalorder %s392_s23, %s392_s23 }
  0x5e   :  { %578 = vmatprep.subr.bf16.mxu0 %v769_v0  ;;  %v406_v26 = vld [vmem:[%s945_s8] ss:$0 sm:$0xff]  ;;  %p734_p4 = scmp.ne.s32.totalorder %s392_s23, %s733_s25  ;;  %p739_p6 = scmp.lt.s32.totalorder %s733_s25, %s733_s25 }
  0x5f   :  { %601 = vmatpush3.bf16.msra.mxu1 %v600_v36 }
  0x60   :  { %602 = vmatprep.subr.bf16.mxu1 %v769_v0  ;;  %p740_p7 = por %p739_p6, %p738_p5 }
  0x61   :  { %580 = vmatpush3.bf16.msra.mxu0 %v579_v33 }
  0x62   :  { %581 = vmatprep.subr.bf16.mxu0 %v769_v0  ;;  %p741_p8 = pnand %p740_p7, %p734_p4 }
  0x63   :  { %604 = vmatpush3.bf16.msra.mxu1 %v603_v42 }
  0x64   :  { %605 = vmatprep.subr.bf16.mxu1 %v769_v0 }
  0x65   :  { %583 = vmatpush3.bf16.msra.mxu0 %v582_v39 }
  0x66   :  { %584 = vmatprep.subr.bf16.mxu0 %v769_v0 }
  0x67   :  { %607 = vmatpush3.bf16.msra.mxu1 %v606_v46 }
  0x68   :  { %608 = vmatprep.subr.bf16.mxu1 %v769_v0 }
  0x69   :  { %586 = vmatpush3.bf16.msra.mxu0 %v585_v45 }
  0x6a   :  { %611 = vmatprep.subr.bf16.mxu0 %v769_v0 }
  0x6b   :  { %610 = vmatpush3.bf16.msra.mxu1 %v609_v50 }
  0x6c   :  { %491 = vmatmul.mubr.f32.vlgmr.msra.gmra.mrb[0].mxu0 %v86_v47 }
  0x6d   :  { %560 = vmatprep.mubr.msk.f32.mxu0 %vm770_vm0, %v771_v1  ;;  %613 = vmatpush3.bf16.msra.mxu0 %v612_v54  ;;  %v284_v1 = vld [vmem:[#allocation8 + $0x48] sm:$0xff] }
  0x6e   :  { %614 = vmatprep.subr.bf16.mxu0 %v769_v0  ;;  %v624_v2 = vpack.c.bf16 %v284_v1, %v283_v63 }
  0x71   :  { %616 = vmatpush3.bf16.msra.mxu0 %v615_v56 }
  0x72   :  { %617 = vmatprep.subr.bf16.mxu0 %v769_v0 }
  0x75   :  { %619 = vmatpush3.bf16.msra.mxu0 %v618_v59 }
  0x76   :  { %620 = vmatprep.subr.bf16.mxu0 %v769_v0 }
  0x79   :  { %622 = vmatpush3.bf16.msra.mxu0 %v621_v62 }
  0x7a   :  { %623 = vmatprep.subr.bf16.mxu0 %v769_v0 }
  0x7d   :  { %625 = vmatpush3.bf16.msra.mxu0 %v624_v2 }
  0x7e   :  { %626 = vmatprep.subr.bf16.mxu0 %v769_v0 }
  0x81   :  { %628 = vmatpush3.bf16.msra.mxu0 %v627_v5 }
  0x82   :  { %629 = vmatprep.subr.bf16.mxu0 %v769_v0 }
  0x85   :  { %631 = vmatpush3.bf16.msra.mxu0 %v630_v8 }
  0x86   :  { %632 = vmatprep.subr.bf16.mxu0 %v769_v0 }
  0x89   :  { %634 = vmatpush3.bf16.msra.mxu0 %v633_v16 }
 0x13f   :  { %v176_v10 = vpop.f32.mrb[0].mxu0 }
 0x140   :  { %v177_v11 = vadd.f32 %v402_v9, %v176_v10  ;;  %v492_v12 = vpop.f32.mrb[1].mxu0 }
 0x142   :  { %v180_v13 = vmax.f32 %v177_v11, 0.0 }
 0x144   :  { %526 = vmatmul.mubr.f32.vlgmr.msra.gmra.mrb[0].mxu1 %v180_v13 }
 0x217   :  { %v270_v18 = vpop.f32.mrb[0].mxu1 }
 0x218   :  { %v271_v19 = vadd.f32 %v403_v17, %v270_v18  ;;  %v527_v0 = vpop.f32.mrb[1].mxu1 }
 0x21a   :  { %v274_v20 = vmax.f32 %v271_v19, 0.0 }
 0x21c   :  { %561 = vmatmul.mubr.f32.vlgmr.msra.gmra.mrb[2].mxu0 %v274_v20 }
 0x2ef   :  { %v364_v22 = vpop.f32.mrb[2].mxu0 }
 0x2f0   :  { %v365_v24 = vadd.f32 %v404_v21, %v364_v22  ;;  %v562_v25 = vpop.f32.mrb[3].mxu0 }
 0x2f2   :  { %v375_v27 = vmax.f32 %v365_v24, %v405_v23 }
 0x2f4   :  { %v383_v28 = vmin.f32 %v375_v27, %v406_v26 }
 0x2f6   :  { %384 = vst [vmem:[#allocation10] sm:$0xff] %v383_v28 }
 0x2f7   :  { %744 = shalt.err (!%p741_p8)
}
 0x2f8   :  { %s745_s0 = scalar_lea.hbm %s946_s9, 128 }
 0x2f9   :  { %p746_p9 = scmp.ne.s32.totalorder %s946_s9, %s745_s0  ;;  %p749_p10 = scmp.lt.u32.totalorder %s745_s0, %s946_s9 }
 0x2fb   :  { %p751_p11 = pnand %p749_p10, %p746_p9 }
 0x2fd   :  { %754 = shalt.err (!%p751_p11)
}
 0x2fe   :  { %394 = dma.vmem_to_hbm [thread:$0]  %s392_s23, 128, %s946_s9, [#allocation4]  }
 0x2ff   :  { %761 = dma.done.wait [#allocation4], 128  }
 0x300   :  { %762 = vsyncadd [#allocation4], 4294967168 }
 0x301   :  { %398 = vsyncpa [#allocation3], 1 }
 0x302   :  { %399 = vsyncpa [#allocation6], 1 }
 0x303   :  { %400 = vsyncpa [#allocation9], 1 }
 0x304   :  { %401 = vsyncpa [#allocation4], 1 }

</bundles_post_ra>
